<compile_context>
chip_gen: v7x
topology: tpu7x:2x2x1
jax: 0.10.0
libtpu: 0.0.40
codegen_flags: <defaults>
</compile_context>

<pallas_src>
import functools

import jax
import jax.numpy as jnp
from jax.experimental import pallas as pl
from jax.experimental.pallas import tpu as pltpu


# ----------------------------------------------------------------------------
# Pallas kernel: direct HBM -> HBM copy via async DMA (no VMEM round-trip).
# ----------------------------------------------------------------------------
def _identity_dma_kernel(x_hbm, o_hbm, sems, *, n_chunks, chunk):
    """Copy x -> o with `n_chunks` concurrent HBM->HBM DMAs (static slices)."""
    if n_chunks == 1:
        cp = pltpu.make_async_copy(x_hbm, o_hbm, sems.at[0])
        cp.start()
        cp.wait()
        return

    copies = []
    for c in range(n_chunks):
        lo = c * chunk  # static Python int -> static slice, zero-cost ref view
        cp = pltpu.make_async_copy(
            x_hbm.at[pl.ds(lo, chunk)],
            o_hbm.at[pl.ds(lo, chunk)],
            sems.at[c],
        )
        cp.start()
        copies.append(cp)
    for cp in copies:
        cp.wait()


# ----------------------------------------------------------------------------
# Wrapper
# ----------------------------------------------------------------------------
def _pick_chunks(leading, nbytes):
    """A few concurrent DMAs for big arrays; one whole-array DMA otherwise."""
    if nbytes >= (8 << 20):  # only bother splitting above ~8 MiB
        for n in (8, 4, 2):
            if leading % n == 0:
                return n
    return 1


def pallas_identity(x):
    # Degenerate shapes (0-d scalars / zero elements): identity is trivially x.
    if x.ndim == 0 or x.size == 0:
        return x

    leading = x.shape[0]
    n_chunks = _pick_chunks(leading, x.size * x.dtype.itemsize)
    chunk = leading // n_chunks

    kernel = functools.partial(
        _identity_dma_kernel, n_chunks=n_chunks, chunk=chunk)

    return pl.pallas_call(
        kernel,
        out_shape=jax.ShapeDtypeStruct(x.shape, x.dtype),
        in_specs=[pl.BlockSpec(memory_space=pl.ANY)],   # raw HBM ref, no auto-DMA
        out_specs=pl.BlockSpec(memory_space=pl.ANY),    # raw HBM ref, no auto-DMA
        scratch_shapes=[pltpu.SemaphoreType.DMA((n_chunks,))],
    )(x)


# ----------------------------------------------------------------------------
if __name__ == "__main__":
    key = jax.random.PRNGKey(0)
    # Small shape consistent with the module (identity accepts any tensor).
    x = jax.random.normal(key, (2, 4, 16, 16), dtype=jnp.float32)

    out = jax.jit(pallas_identity)(x)
    out = jax.block_until_ready(out)

    assert out.shape == x.shape, (out.shape, x.shape)
    assert out.dtype == x.dtype, (out.dtype, x.dtype)
    assert jnp.array_equal(out, x), "identity mismatch"

    print("KERNEL_OK")
</pallas_src>

<mosaic_0001>
module attributes {stable_mosaic.version = 11 : i64} {
  func.func @_identity_dma_kernel(%arg0: memref<2x4x16x16xf32, #tpu.memory_space<any>>, %arg1: memref<2x4x16x16xf32, #tpu.memory_space<any>>, %arg2: memref<1x!tpu.dma_semaphore, #tpu.memory_space<semaphore_mem>>) attributes {dimension_semantics = [], scalar_prefetch = 0 : i64, scratch_operands = 1 : i64, tpu.core_type = #tpu.core_type<tc>} {
    %c0_i32 = arith.constant 0 : i32
    %0 = tpu.memref_slice %arg2[%c0_i32] : memref<1x!tpu.dma_semaphore, #tpu.memory_space<semaphore_mem>> -> memref<1x!tpu.dma_semaphore, #tpu.memory_space<semaphore_mem>>
    %1 = tpu.memref_squeeze %0 : memref<1x!tpu.dma_semaphore, #tpu.memory_space<semaphore_mem>> -> memref<!tpu.dma_semaphore, #tpu.memory_space<semaphore_mem>>
    tpu.enqueue_dma source(%arg0 : memref<2x4x16x16xf32, #tpu.memory_space<any>>) target(%arg1 : memref<2x4x16x16xf32, #tpu.memory_space<any>>) target_semaphore(%1 : memref<!tpu.dma_semaphore, #tpu.memory_space<semaphore_mem>>)
    %c0_i32_0 = arith.constant 0 : i32
    %2 = tpu.memref_slice %arg2[%c0_i32_0] : memref<1x!tpu.dma_semaphore, #tpu.memory_space<semaphore_mem>> -> memref<1x!tpu.dma_semaphore, #tpu.memory_space<semaphore_mem>>
    %3 = tpu.memref_squeeze %2 : memref<1x!tpu.dma_semaphore, #tpu.memory_space<semaphore_mem>> -> memref<!tpu.dma_semaphore, #tpu.memory_space<semaphore_mem>>
    tpu.wait_dma2 semaphore(%3 : memref<!tpu.dma_semaphore, #tpu.memory_space<semaphore_mem>>) src(%arg0 : memref<2x4x16x16xf32, #tpu.memory_space<any>>) dst(%arg1 : memref<2x4x16x16xf32, #tpu.memory_space<any>>)
    return
  }
}

</mosaic_0001>

<bundles_post_ra>
// kernel: pallas_identity.1
= control target key start
LH: loop header
LB: loop body
LE: loop exit
PB: predicated region body
PF: predicated region fallthrough
CT: control target
= control target key end

     0   :  { %s36_s6 = smov [#allocation2]   ;;  %s37_s7 = smov [#allocation3]   ;;  %s55_s0 = inlined_call_operand.hbm [shape: f32[2,4,16,16], index: 0, kind: input, shape index: {}]   ;;  %s56_s1 = inlined_call_operand.hbm [shape: f32[2,4,16,16], index: 1, kind: output, shape index: {}]  }
   0x1   :  { %s38_s8 = smov 0  }
   0x2   :  { %18 = dma.general %s55_s0, 2048, %s56_s1, %s36_s6, %s37_s7, [#allocation4], %s38_s8, 0  }
   0x3   :  { %34 = dma.done.wait [#allocation2], 2048 }
   0x4   :  { %35 = vsyncadd [#allocation2], 4294965248 }
   0x5   :  { %24 = vsyncmov [#allocation2] }
   0x8   :  { %s25_s13 = vpop.sfrf %24 }
   0x9   :  { %p30_p0 = scmp.ne.s32.totalorder %s25_s13, 0 }
   0xb   :  { %29 = shalt.err (%p30_p0)  }

</bundles_post_ra>
